<compile_context>
chip_gen: v6e
topology: v6e:2x2x1
jax: 0.10.0
libtpu: 0.0.40
codegen_flags: <defaults>
</compile_context>

<pallas_src>
import functools

import jax
import jax.numpy as jnp
from jax.experimental import pallas as pl
from jax.experimental.pallas import tpu as pltpu

HIDDEN = 128
LANE = 128
SUBLANE = 8
MAX_BATCH_TILE = 512  # rows per grid step; 512*1024*4B*2buf ~ 4 MiB obs VMEM


def _round_up(x, m):
    return ((x + m - 1) // m) * m


def _mlp_kernel(x_ref,
                w1_ref, b1_ref,
                w2_ref, b2_ref,
                w3_ref, b3_ref,
                w4_ref, b4_ref,
                o_ref):
    """One batch tile of the 4-layer MLP: 4 MXU matmuls + VPU bias/ReLU in VMEM.

    Weights arrive as bf16 (halved HBM traffic); activations are cast to bf16
    only at the MXU inputs, accumulation and bias/ReLU stay f32.
    """
    def linear(x_f32, w_ref, b_ref):
        return jnp.dot(x_f32.astype(jnp.bfloat16), w_ref[...],
                       preferred_element_type=jnp.float32) + b_ref[...]

    h = jnp.maximum(linear(x_ref[...], w1_ref, b1_ref), 0.0)
    h = jnp.maximum(linear(h, w2_ref, b2_ref), 0.0)
    h = jnp.maximum(linear(h, w3_ref, b3_ref), 0.0)
    o_ref[...] = linear(h, w4_ref, b4_ref)


@functools.partial(jax.jit, static_argnames=("out_dim",))
def teacher_net_apply(obs_flat, params, out_dim):
    """obs_flat: (B, in_dim) f32.  params: bf16 weights / f32 biases, w4/b4 lane-padded.
    Returns logits (B, out_dim) f32."""
    w1, b1, w2, b2, w3, b3, w4, b4 = params
    B, in_dim = obs_flat.shape
    out_pad = w4.shape[1]  # lane-dense padded output width (multiple of 128)

    # Batch tiling: TB multiple of the f32 sublane (8), capped for VMEM budget.
    tb = min(MAX_BATCH_TILE, _round_up(B, SUBLANE))
    b_pad = _round_up(B, tb)
    if b_pad != B:
        obs_flat = jnp.pad(obs_flat, ((0, b_pad - B), (0, 0)))
    n_steps = b_pad // tb

    flops = 2 * b_pad * (in_dim * HIDDEN + 2 * HIDDEN * HIDDEN + HIDDEN * out_pad)
    bytes_accessed = (
        b_pad * in_dim * 4                      # obs in (f32)
        + b_pad * out_pad * 4                   # logits out (f32)
        + sum(int(p.size) * p.dtype.itemsize for p in params))  # bf16 W, f32 b
    cost = pl.CostEstimate(flops=flops, transcendentals=0,
                           bytes_accessed=bytes_accessed)

    def resident(shape):
        # Constant block index: stays VMEM-resident across all grid steps.
        return pl.BlockSpec(shape, lambda i, _s=shape: (0,) * len(_s))

    logits_pad = pl.pallas_call(
        _mlp_kernel,
        out_shape=jax.ShapeDtypeStruct((b_pad, out_pad), jnp.float32),
        grid=(n_steps,),
        in_specs=[
            pl.BlockSpec((tb, in_dim), lambda i: (i, 0)),
            resident(w1.shape), resident(b1.shape),
            resident(w2.shape), resident(b2.shape),
            resident(w3.shape), resident(b3.shape),
            resident(w4.shape), resident(b4.shape),
        ],
        out_specs=pl.BlockSpec((tb, out_pad), lambda i: (i, 0)),
        compiler_params=pltpu.CompilerParams(
            dimension_semantics=("parallel",)),
        cost_estimate=cost,
    )(obs_flat, w1, b1, w2, b2, w3, b3, w4, b4)

    return logits_pad[:B, :out_dim]


def teacher_net_forward(obs, params, out_dim, state=None, info=None):
    """Mirrors TeacherNet.forward: flatten to (batch, -1), run MLP, return (logits, state)."""
    obs = jnp.asarray(obs, dtype=jnp.float32)
    batch = obs.shape[0]
    obs_flat = obs.reshape(batch, -1)
    logits = teacher_net_apply(obs_flat, params, out_dim)
    return logits, state


def init_teacher_net_params(key, in_dim, out_dim, hidden=HIDDEN):
    """Weights stored (in_features, out_features) in bf16; biases (1, out) in f32.
    The last layer is zero-padded on the output axis to a multiple of 128 lanes.
    # TODO(synk): torch.nn.Linear uses kaiming_uniform(a=sqrt(5)); this simple
    # U[-1/sqrt(fan_in), 1/sqrt(fan_in)] init is not bit-identical to PyTorch."""
    out_pad = _round_up(max(out_dim, LANE), LANE)
    dims = [(in_dim, hidden), (hidden, hidden), (hidden, hidden), (hidden, out_dim)]
    params = []
    for li, (fan_in, fan_out) in enumerate(dims):
        key, kw, kb = jax.random.split(key, 3)
        bound = 1.0 / jnp.sqrt(jnp.float32(fan_in))
        w = jax.random.uniform(kw, (fan_in, fan_out), jnp.float32, -bound, bound)
        b = jax.random.uniform(kb, (1, fan_out), jnp.float32, -bound, bound)
        if li == len(dims) - 1 and fan_out != out_pad:
            w = jnp.pad(w, ((0, 0), (0, out_pad - fan_out)))
            b = jnp.pad(b, ((0, 0), (0, out_pad - fan_out)))
        params.extend([w.astype(jnp.bfloat16), b.astype(jnp.float32)])
    return tuple(params)


def _reference_forward(obs, params, out_dim):
    """Pure-JAX reference with identical arithmetic (bf16 weights, f32 accumulation)."""
    w1, b1, w2, b2, w3, b3, w4, b4 = params
    x = obs.reshape(obs.shape[0], -1).astype(jnp.float32)

    def linear(x_f32, w, b):
        return jnp.dot(x_f32.astype(jnp.bfloat16), w,
                       preferred_element_type=jnp.float32) + b

    h = jnp.maximum(linear(x, w1, b1), 0.0)
    h = jnp.maximum(linear(h, w2, b2), 0.0)
    h = jnp.maximum(linear(h, w3, b3), 0.0)
    return linear(h, w4, b4)[:, :out_dim]


if __name__ == "__main__":
    # Small synthetic "state": (B, C, H, W) = (2, 4, 16, 16) -> in_dim = 1024.
    # Small synthetic discrete action space: 6 actions (Qbert has 6).
    key = jax.random.PRNGKey(0)
    k_obs, k_params = jax.random.split(key)

    B, C, H, W = 2, 4, 16, 16
    in_dim = C * H * W
    out_dim = 6

    obs = jax.random.normal(k_obs, (B, C, H, W), dtype=jnp.float32)
    params = init_teacher_net_params(k_params, in_dim, out_dim)

    logits, state = teacher_net_forward(obs, params, out_dim)
    logits = jax.block_until_ready(logits)

    ref = _reference_forward(obs, params, out_dim)
    assert logits.shape == (B, out_dim), logits.shape
    assert jnp.allclose(logits, ref, atol=2e-3, rtol=2e-3), "mismatch vs reference"
    assert state is None

    print("KERNEL_OK")
</pallas_src>

<mosaic_0001>
module attributes {stable_mosaic.version = 11 : i64} {
  func.func @_mlp_kernel(%arg0: i32, %arg1: memref<8x1024xf32, #tpu.memory_space<vmem>>, %arg2: memref<1024x128xbf16, #tpu.memory_space<vmem>>, %arg3: memref<1x128xf32, #tpu.memory_space<vmem>>, %arg4: memref<128x128xbf16, #tpu.memory_space<vmem>>, %arg5: memref<1x128xf32, #tpu.memory_space<vmem>>, %arg6: memref<128x128xbf16, #tpu.memory_space<vmem>>, %arg7: memref<1x128xf32, #tpu.memory_space<vmem>>, %arg8: memref<128x128xbf16, #tpu.memory_space<vmem>>, %arg9: memref<1x128xf32, #tpu.memory_space<vmem>>, %arg10: memref<8x128xf32, #tpu.memory_space<vmem>>) attributes {dimension_semantics = [#tpu.dimension_semantics<parallel>], iteration_bounds = array<i64: 1>, scalar_prefetch = 0 : i64, scratch_operands = 0 : i64, tpu.core_type = #tpu.core_type<tc>, window_params = [{transform_indices = @transform_0, window_bounds = array<i64: 8, 1024>}, {pipeline_mode = #tpu.pipeline_mode<synchronous>, transform_indices = @transform_1, window_bounds = array<i64: 1024, 128>}, {pipeline_mode = #tpu.pipeline_mode<synchronous>, transform_indices = @transform_2, window_bounds = array<i64: 1, 128>}, {pipeline_mode = #tpu.pipeline_mode<synchronous>, transform_indices = @transform_3, window_bounds = array<i64: 128, 128>}, {pipeline_mode = #tpu.pipeline_mode<synchronous>, transform_indices = @transform_4, window_bounds = array<i64: 1, 128>}, {pipeline_mode = #tpu.pipeline_mode<synchronous>, transform_indices = @transform_5, window_bounds = array<i64: 128, 128>}, {pipeline_mode = #tpu.pipeline_mode<synchronous>, transform_indices = @transform_6, window_bounds = array<i64: 1, 128>}, {pipeline_mode = #tpu.pipeline_mode<synchronous>, transform_indices = @transform_7, window_bounds = array<i64: 128, 128>}, {pipeline_mode = #tpu.pipeline_mode<synchronous>, transform_indices = @transform_8, window_bounds = array<i64: 1, 128>}, {transform_indices = @transform_9, window_bounds = array<i64: 8, 128>}]} {
    %c0 = arith.constant 0 : index
    %c0_0 = arith.constant 0 : index
    %0 = vector.load %arg1[%c0, %c0_0] : memref<8x1024xf32, #tpu.memory_space<vmem>>, vector<8x1024xf32>
    %1 = arith.truncf %0 : vector<8x1024xf32> to vector<8x1024xbf16>
    %c0_1 = arith.constant 0 : index
    %c0_2 = arith.constant 0 : index
    %2 = vector.load %arg2[%c0_1, %c0_2] : memref<1024x128xbf16, #tpu.memory_space<vmem>>, vector<1024x128xbf16>
    %cst = arith.constant dense<0.000000e+00> : vector<8x128xf32>
    %3 = tpu.matmul %1, %2, %cst {dimension_numbers = #tpu.dot_dimension_numbers<[1], [0], [0], [1], [0, 0, 1, 1], [], []>} : vector<8x1024xbf16>, vector<1024x128xbf16>, vector<8x128xf32> -> vector<8x128xf32>
    %c0_3 = arith.constant 0 : index
    %c0_4 = arith.constant 0 : index
    %4 = vector.load %arg3[%c0_3, %c0_4] : memref<1x128xf32, #tpu.memory_space<vmem>>, vector<1x128xf32>
    %5 = vector.broadcast %4 : vector<1x128xf32> to vector<8x128xf32>
    %6 = arith.addf %3, %5 : vector<8x128xf32>
    %cst_5 = arith.constant 0.000000e+00 : f32
    %7 = vector.broadcast %cst_5 : f32 to vector<8x128xf32>
    %8 = arith.maximumf %6, %7 : vector<8x128xf32>
    %9 = arith.truncf %8 : vector<8x128xf32> to vector<8x128xbf16>
    %c0_6 = arith.constant 0 : index
    %c0_7 = arith.constant 0 : index
    %10 = vector.load %arg4[%c0_6, %c0_7] : memref<128x128xbf16, #tpu.memory_space<vmem>>, vector<128x128xbf16>
    %cst_8 = arith.constant dense<0.000000e+00> : vector<8x128xf32>
    %11 = tpu.matmul %9, %10, %cst_8 {dimension_numbers = #tpu.dot_dimension_numbers<[1], [0], [0], [1], [0, 0, 1, 1], [], []>} : vector<8x128xbf16>, vector<128x128xbf16>, vector<8x128xf32> -> vector<8x128xf32>
    %c0_9 = arith.constant 0 : index
    %c0_10 = arith.constant 0 : index
    %12 = vector.load %arg5[%c0_9, %c0_10] : memref<1x128xf32, #tpu.memory_space<vmem>>, vector<1x128xf32>
    %13 = vector.broadcast %12 : vector<1x128xf32> to vector<8x128xf32>
    %14 = arith.addf %11, %13 : vector<8x128xf32>
    %cst_11 = arith.constant 0.000000e+00 : f32
    %15 = vector.broadcast %cst_11 : f32 to vector<8x128xf32>
    %16 = arith.maximumf %14, %15 : vector<8x128xf32>
    %17 = arith.truncf %16 : vector<8x128xf32> to vector<8x128xbf16>
    %c0_12 = arith.constant 0 : index
    %c0_13 = arith.constant 0 : index
    %18 = vector.load %arg6[%c0_12, %c0_13] : memref<128x128xbf16, #tpu.memory_space<vmem>>, vector<128x128xbf16>
    %cst_14 = arith.constant dense<0.000000e+00> : vector<8x128xf32>
    %19 = tpu.matmul %17, %18, %cst_14 {dimension_numbers = #tpu.dot_dimension_numbers<[1], [0], [0], [1], [0, 0, 1, 1], [], []>} : vector<8x128xbf16>, vector<128x128xbf16>, vector<8x128xf32> -> vector<8x128xf32>
    %c0_15 = arith.constant 0 : index
    %c0_16 = arith.constant 0 : index
    %20 = vector.load %arg7[%c0_15, %c0_16] : memref<1x128xf32, #tpu.memory_space<vmem>>, vector<1x128xf32>
    %21 = vector.broadcast %20 : vector<1x128xf32> to vector<8x128xf32>
    %22 = arith.addf %19, %21 : vector<8x128xf32>
    %cst_17 = arith.constant 0.000000e+00 : f32
    %23 = vector.broadcast %cst_17 : f32 to vector<8x128xf32>
    %24 = arith.maximumf %22, %23 : vector<8x128xf32>
    %25 = arith.truncf %24 : vector<8x128xf32> to vector<8x128xbf16>
    %c0_18 = arith.constant 0 : index
    %c0_19 = arith.constant 0 : index
    %26 = vector.load %arg8[%c0_18, %c0_19] : memref<128x128xbf16, #tpu.memory_space<vmem>>, vector<128x128xbf16>
    %cst_20 = arith.constant dense<0.000000e+00> : vector<8x128xf32>
    %27 = tpu.matmul %25, %26, %cst_20 {dimension_numbers = #tpu.dot_dimension_numbers<[1], [0], [0], [1], [0, 0, 1, 1], [], []>} : vector<8x128xbf16>, vector<128x128xbf16>, vector<8x128xf32> -> vector<8x128xf32>
    %c0_21 = arith.constant 0 : index
    %c0_22 = arith.constant 0 : index
    %28 = vector.load %arg9[%c0_21, %c0_22] : memref<1x128xf32, #tpu.memory_space<vmem>>, vector<1x128xf32>
    %29 = vector.broadcast %28 : vector<1x128xf32> to vector<8x128xf32>
    %30 = arith.addf %27, %29 : vector<8x128xf32>
    %c0_23 = arith.constant 0 : index
    %c0_24 = arith.constant 0 : index
    %31 = vector.load %arg10[%c0_23, %c0_24] : memref<8x128xf32, #tpu.memory_space<vmem>>, vector<8x128xf32>
    tpu.vector_store %arg10[%c0_23, %c0_24], %30 {strides = array<i32>} : memref<8x128xf32, #tpu.memory_space<vmem>>, vector<8x128xf32>,
    return
  }
  func.func @transform_0(%arg0: i32) -> (i32, i32) {
    %c0_i32 = arith.constant 0 : i32
    %c0_i32_0 = arith.constant 0 : i32
    return %arg0, %c0_i32 : i32, i32
  }
  func.func @transform_1(%arg0: i32) -> (i32, i32) {
    %c0_i32 = arith.constant 0 : i32
    %c0_i32_0 = arith.constant 0 : i32
    %c0_i32_1 = arith.constant 0 : i32
    return %c0_i32, %c0_i32_0 : i32, i32
  }
  func.func @transform_2(%arg0: i32) -> (i32, i32) {
    %c0_i32 = arith.constant 0 : i32
    %c0_i32_0 = arith.constant 0 : i32
    %c0_i32_1 = arith.constant 0 : i32
    return %c0_i32, %c0_i32_0 : i32, i32
  }
  func.func @transform_3(%arg0: i32) -> (i32, i32) {
    %c0_i32 = arith.constant 0 : i32
    %c0_i32_0 = arith.constant 0 : i32
    %c0_i32_1 = arith.constant 0 : i32
    return %c0_i32, %c0_i32_0 : i32, i32
  }
  func.func @transform_4(%arg0: i32) -> (i32, i32) {
    %c0_i32 = arith.constant 0 : i32
    %c0_i32_0 = arith.constant 0 : i32
    %c0_i32_1 = arith.constant 0 : i32
    return %c0_i32, %c0_i32_0 : i32, i32
  }
  func.func @transform_5(%arg0: i32) -> (i32, i32) {
    %c0_i32 = arith.constant 0 : i32
    %c0_i32_0 = arith.constant 0 : i32
    %c0_i32_1 = arith.constant 0 : i32
    return %c0_i32, %c0_i32_0 : i32, i32
  }
  func.func @transform_6(%arg0: i32) -> (i32, i32) {
    %c0_i32 = arith.constant 0 : i32
    %c0_i32_0 = arith.constant 0 : i32
    %c0_i32_1 = arith.constant 0 : i32
    return %c0_i32, %c0_i32_0 : i32, i32
  }
  func.func @transform_7(%arg0: i32) -> (i32, i32) {
    %c0_i32 = arith.constant 0 : i32
    %c0_i32_0 = arith.constant 0 : i32
    %c0_i32_1 = arith.constant 0 : i32
    return %c0_i32, %c0_i32_0 : i32, i32
  }
  func.func @transform_8(%arg0: i32) -> (i32, i32) {
    %c0_i32 = arith.constant 0 : i32
    %c0_i32_0 = arith.constant 0 : i32
    %c0_i32_1 = arith.constant 0 : i32
    return %c0_i32, %c0_i32_0 : i32, i32
  }
  func.func @transform_9(%arg0: i32) -> (i32, i32) {
    %c0_i32 = arith.constant 0 : i32
    %c0_i32_0 = arith.constant 0 : i32
    return %arg0, %c0_i32 : i32, i32
  }
}

</mosaic_0001>

<bundles_post_ra>
// kernel: teacher_net_apply.1
= control target key start
LH: loop header
LB: loop body
LE: loop exit
PB: predicated region body
PF: predicated region fallthrough
CT: control target
= control target key end

     0   :  { %14 = vsyncpa [#allocation3], 0  ;;  %s1700_s0 = inlined_call_operand.vmem [shape: f32[8,1024], index: 0, kind: input, shape index: {}]   ;;  %s1701_s1 = inlined_call_operand.hbm [shape: bf16[1024,128], index: 1, kind: input, shape index: {}]   ;;  %s1702_s2 = inlined_call_operand.vmem [shape: f32[1,128], index: 2, kind: input, shape index: {}]   ;;  %s1703_s3 = inlined_call_operand.vmem [shape: bf16[128,128], index: 3, kind: input, shape index: {}]   ;;  %s1704_s4 = inlined_call_operand.vmem [shape: f32[1,128], index: 4, kind: input, shape index: {}]   ;;  %s1705_s5 = inlined_call_operand.hbm [shape: bf16[128,128], index: 5, kind: input, shape index: {}]   ;;  %s1706_s6 = inlined_call_operand.vmem [shape: f32[1,128], index: 6, kind: input, shape index: {}]   ;;  %s1707_s7 = inlined_call_operand.hbm [shape: bf16[128,128], index: 7, kind: input, shape index: {}]   ;;  %s1708_s8 = inlined_call_operand.vmem [shape: f32[1,128], index: 8, kind: input, shape index: {}]   ;;  %s1709_s9 = inlined_call_operand.vmem [shape: f32[8,128], index: 9, kind: output, shape index: {}]  }
   0x1   :  { %15 = vsyncpa [#allocation5], 0  ;;  %s1541_s30 = smov [#allocation4]   ;;  %s1542_s11 = smov [#allocation2]  }
   0x2   :  { %s41_s10 = sshll.u32 %s1541_s30, 4  ;;  %s23_s12 = sshll.u32 %s1542_s11, 4  ;;  %s42_s10 = int_to_ptr.vmem [resolvable:$true] %s41_s10  ;;  %s24_s12 = int_to_ptr.vmem [resolvable:$true] %s23_s12 }
   0x3   :  { %s1485_s13 = scalar_lea.vmem %s42_s10, 1024  ;;  %p1490_p1 = scmp.lt.s32.totalorder %s42_s10, %s42_s10 }
   0x4   :  { %p1486_p0 = scmp.ne.s32.totalorder %s42_s10, %s1485_s13  ;;  %p1491_p2 = scmp.lt.s32.totalorder %s1485_s13, %s1485_s13 }
   0x6   :  { %p1492_p3 = por %p1491_p2, %p1490_p1 }
   0x8   :  { %p1493_p4 = pnand %p1492_p3, %p1486_p0 }
   0xa   :  { %1496 = shalt.err (!%p1493_p4)
}
   0xb   :  { %s1543_s14 = smov 64   ;;  %s1544_s15 = smov 4  }
   0xc   :  { %47 = dma.hbm_to_vmem [thread:$0]  %s1705_s5, 1024, %s42_s10, [#allocation5], %s1543_s14, %s1543_s14, %s1544_s15  }
   0xd   :  { %s1505_s18 = scalar_lea.vmem %s24_s12, 8192  ;;  %p1510_p6 = scmp.lt.s32.totalorder %s24_s12, %s24_s12 }
   0xe   :  { %p1506_p5 = scmp.ne.s32.totalorder %s24_s12, %s1505_s18  ;;  %p1511_p7 = scmp.lt.s32.totalorder %s1505_s18, %s1505_s18 }
  0x10   :  { %p1512_p8 = por %p1511_p7, %p1510_p6 }
  0x12   :  { %p1513_p9 = pnand %p1512_p8, %p1506_p5 }
  0x14   :  { %1516 = shalt.err (!%p1513_p9)
}
  0x15   :  { %29 = dma.hbm_to_vmem [thread:$0]  %s1701_s1, 8192, %s24_s12, [#allocation3], %s1543_s14, %s1543_s14, %s1544_s15  }
  0x16   :  { %s1545_s21 = smov [#allocation6]  }
  0x17   :  { %s55_s22 = sshll.u32 %s1545_s21, 4  ;;  %s56_s22 = int_to_ptr.vmem [resolvable:$true] %s55_s22 }
  0x18   :  { %s1525_s23 = scalar_lea.vmem %s56_s22, 1024  ;;  %p1530_p11 = scmp.lt.s32.totalorder %s56_s22, %s56_s22 }
  0x19   :  { %p1526_p10 = scmp.ne.s32.totalorder %s56_s22, %s1525_s23  ;;  %p1531_p12 = scmp.lt.s32.totalorder %s1525_s23, %s1525_s23 }
  0x1b   :  { %p1532_p13 = por %p1531_p12, %p1530_p11 }
  0x1d   :  { %p1533_p0 = pnand %p1532_p13, %p1526_p10 }
  0x1f   :  { %1536 = shalt.err (!%p1533_p0)
}
  0x20   :  { %61 = dma.hbm_to_vmem [thread:$0]  %s1707_s7, 1024, %s56_s22, [#allocation5], %s1543_s14, %s1543_s14, %s1544_s15  }
  0x21   :  { %1537 = dma.done.wait [#allocation3], 8192  }
  0x22   :  { %1538 = vsyncadd [#allocation3], 4294959104 }
  0x23   :  { %1539 = dma.done.wait [#allocation5], 2048  }
  0x24   :  { %1540 = vsyncadd [#allocation5], 4294965248  ;;  %v1389_v0 = vld [vmem:[#allocation2 + $0x78] sm:$0xff]   ;;  %v1393_v4 = vld [vmem:[#allocation2 + $0x70] sm:$0xff]   ;;  %vm1547_vm0 = vmmov 0  }
  0x25   :  { %v1390_v1 = vld [vmem:[#allocation2 + $0xf8] sm:$0xff]   ;;  %1207 = vmatprep.subr.bf16.mxu0 %v1389_v0  ;;  %v1394_v5 = vld [vmem:[#allocation2 + $0xf0] sm:$0xff]   ;;  %v1397_v8 = vld [vmem:[#allocation2 + $0x68] sm:$0xff]  }
  0x26   :  { %v1391_v2 = vld [vmem:[#allocation2 + $0x38] sm:$0xff]   ;;  %1229 = vmatprep.subr.bf16.mxu1 %v1390_v1  ;;  %v1395_v6 = vld [vmem:[#allocation2 + $0x30] sm:$0xff]   ;;  %v1398_v9 = vld [vmem:[#allocation2 + $0xe8] sm:$0xff]  }
  0x27   :  { %v1392_v3 = vld [vmem:[#allocation2 + $0xb8] sm:$0xff]   ;;  %1208 = vmatpush3.bf16.msra.mxu0 %v1391_v2  ;;  %v1396_v7 = vld [vmem:[#allocation2 + $0xb0] sm:$0xff]   ;;  %v1399_v10 = vld [vmem:[#allocation2 + $0x28] sm:$0xff]  }
  0x28   :  { %1230 = vmatpush3.bf16.msra.mxu1 %v1392_v3  ;;  %1209 = vmatprep.subr.bf16.mxu0 %v1393_v4  ;;  %v1400_v11 = vld [vmem:[#allocation2 + $0xa8] sm:$0xff]   ;;  %v1401_v12 = vld [vmem:[#allocation2 + $0x60] sm:$0xff]   ;;  %v1405_v16 = vld [vmem:[#allocation2 + $0x58] sm:$0xff]  }
  0x29   :  { %1231 = vmatprep.subr.bf16.mxu1 %v1394_v5  ;;  %v1402_v13 = vld [vmem:[#allocation2 + $0xe0] sm:$0xff]   ;;  %v1406_v17 = vld [vmem:[#allocation2 + $0xd8] sm:$0xff]   ;;  %v1409_v20 = vld [vmem:[#allocation2 + $0x50] sm:$0xff]  }
  0x2a   :  { %v1403_v14 = vld [vmem:[#allocation2 + $0x20] sm:$0xff]   ;;  %v1407_v18 = vld [vmem:[#allocation2 + $0x18] sm:$0xff]   ;;  %v1410_v21 = vld [vmem:[#allocation2 + $0xd0] sm:$0xff]  }
  0x2b   :  { %1210 = vmatpush3.bf16.msra.mxu0 %v1395_v6  ;;  %v1404_v15 = vld [vmem:[#allocation2 + $0xa0] sm:$0xff]   ;;  %v1408_v19 = vld [vmem:[#allocation2 + $0x98] sm:$0xff]   ;;  %v1411_v22 = vld [vmem:[#allocation2 + $0x10] sm:$0xff]  }
  0x2c   :  { %1232 = vmatpush3.bf16.msra.mxu1 %v1396_v7  ;;  %1211 = vmatprep.subr.bf16.mxu0 %v1397_v8  ;;  %v1412_v23 = vld [vmem:[#allocation2 + $0x90] sm:$0xff]   ;;  %v1413_v24 = vld [vmem:[#allocation2 + $0x48] sm:$0xff]   ;;  %v1417_v28 = vld [vmem:[#allocation2 + $0x40] sm:$0xff]  }
  0x2d   :  { %1233 = vmatprep.subr.bf16.mxu1 %v1398_v9  ;;  %v1414_v25 = vld [vmem:[#allocation2 + $0xc8] sm:$0xff]   ;;  %v1418_v29 = vld [vmem:[#allocation2 + $0xc0] sm:$0xff]   ;;  %v77_v33 = vld [vmem:[%s1700_s0 + $0x18] sm:$0xff] }
  0x2e   :  { %v1415_v26 = vld [vmem:[#allocation2 + $0x8] sm:$0xff]   ;;  %v1419_v30 = vld [vmem:[#allocation2] sm:$0xff]   ;;  %v85_v36 = vpack.c.bf16 %v77_v33, %v77_v33  ;;  %v76_v38 = vld [vmem:[%s1700_s0 + $0x10] sm:$0xff] }
  0x2f   :  { %1212 = vmatpush3.bf16.msra.mxu0 %v1399_v10  ;;  %v1416_v27 = vld [vmem:[#allocation2 + $0x88] sm:$0xff]   ;;  %v1420_v31 = vld [vmem:[#allocation2 + $0x80] sm:$0xff]   ;;  %v84_v39 = vpack.c.bf16 %v76_v38, %v76_v38  ;;  %v1421_v40 = vld [vmem:[#allocation2 + $0x178] sm:$0xff]  }
  0x30   :  { %1234 = vmatpush3.bf16.msra.mxu1 %v1400_v11  ;;  %1213 = vmatprep.subr.bf16.mxu0 %v1401_v12  ;;  %v75_v32 = vld [vmem:[%s1700_s0 + $0x8] sm:$0xff]  ;;  %v74_v34 = vld [vmem:[%s1700_s0] sm:$0xff]  ;;  %v1422_v41 = vld [vmem:[#allocation2 + $0x1f8] sm:$0xff]  }
  0x31   :  { %1235 = vmatprep.subr.bf16.mxu1 %v1402_v13  ;;  %v83_v35 = vpack.c.bf16 %v75_v32, %v75_v32  ;;  %v82_v37 = vpack.c.bf16 %v74_v34, %v74_v34  ;;  %681 = vmatprep.mubr.bf16.mxu1 %v85_v36  ;;  %v1423_v42 = vld [vmem:[#allocation2 + $0x138] sm:$0xff]   ;;  %v1425_v44 = vld [vmem:[#allocation2 + $0x170] sm:$0xff]   ;;  %v1429_v48 = vld [vmem:[#allocation2 + $0x168] sm:$0xff]  }
  0x32   :  { %v1424_v43 = vld [vmem:[#allocation2 + $0x1b8] sm:$0xff]   ;;  %v1426_v45 = vld [vmem:[#allocation2 + $0x1f0] sm:$0xff]   ;;  %v1430_v49 = vld [vmem:[#allocation2 + $0x1e8] sm:$0xff]  }
  0x33   :  { %1214 = vmatpush3.bf16.msra.mxu0 %v1403_v14  ;;  %641 = vmatprep.mubr.bf16.mxu0 %v83_v35  ;;  %v1427_v46 = vld [vmem:[#allocation2 + $0x130] sm:$0xff]   ;;  %v1431_v50 = vld [vmem:[#allocation2 + $0x128] sm:$0xff]   ;;  %v1433_v52 = vld [vmem:[#allocation2 + $0x160] sm:$0xff]  }
  0x34   :  { %1236 = vmatpush3.bf16.msra.mxu1 %v1404_v15  ;;  %1215 = vmatprep.subr.bf16.mxu0 %v1405_v16  ;;  %v1428_v47 = vld [vmem:[#allocation2 + $0x1b0] sm:$0xff]   ;;  %v1432_v51 = vld [vmem:[#allocation2 + $0x1a8] sm:$0xff]   ;;  %v1434_v53 = vld [vmem:[#allocation2 + $0x1e0] sm:$0xff]  }
  0x35   :  { %1237 = vmatprep.subr.bf16.mxu1 %v1406_v17  ;;  %v1435_v54 = vld [vmem:[#allocation2 + $0x120] sm:$0xff]   ;;  %v1437_v56 = vld [vmem:[#allocation2 + $0x158] sm:$0xff]   ;;  %v1441_v60 = vld [vmem:[#allocation2 + $0x150] sm:$0xff]   ;;  %v1546_v17 = vmov 0.0  }
  0x36   :  { %v1436_v55 = vld [vmem:[#allocation2 + $0x1a0] sm:$0xff]   ;;  %v1438_v57 = vld [vmem:[#allocation2 + $0x1d8] sm:$0xff]   ;;  %v1442_v61 = vld [vmem:[#allocation2 + $0x1d0] sm:$0xff]  }
  0x37   :  { %1216 = vmatpush3.bf16.msra.mxu0 %v1407_v18  ;;  %v1439_v58 = vld [vmem:[#allocation2 + $0x118] sm:$0xff]   ;;  %v1443_v62 = vld [vmem:[#allocation2 + $0x110] sm:$0xff]   ;;  %v1445_v0 = vld [vmem:[#allocation2 + $0x148] sm:$0xff]  }
  0x38   :  { %1238 = vmatpush3.bf16.msra.mxu1 %v1408_v19  ;;  %1217 = vmatprep.subr.bf16.mxu0 %v1409_v20  ;;  %v1440_v59 = vld [vmem:[#allocation2 + $0x198] sm:$0xff]   ;;  %v1444_v63 = vld [vmem:[#allocation2 + $0x190] sm:$0xff]   ;;  %v1446_v1 = vld [vmem:[#allocation2 + $0x1c8] sm:$0xff]  }
  0x39   :  { %1239 = vmatprep.subr.bf16.mxu1 %v1410_v21  ;;  %v1447_v2 = vld [vmem:[#allocation2 + $0x108] sm:$0xff]   ;;  %v1449_v4 = vld [vmem:[#allocation2 + $0x140] sm:$0xff]   ;;  %v81_v9 = vld [vmem:[%s1700_s0 + $0x38] sm:$0xff] }
  0x3a   :  { %v1448_v3 = vld [vmem:[#allocation2 + $0x188] sm:$0xff]   ;;  %v1450_v5 = vld [vmem:[#allocation2 + $0x1c0] sm:$0xff]   ;;  %v89_v11 = vpack.c.bf16 %v81_v9, %v81_v9  ;;  %v80_v13 = vld [vmem:[%s1700_s0 + $0x30] sm:$0xff] }
  0x3b   :  { %1218 = vmatpush3.bf16.msra.mxu0 %v1411_v22  ;;  %v1451_v6 = vld [vmem:[#allocation2 + $0x100] sm:$0xff]   ;;  %v79_v8 = vld [vmem:[%s1700_s0 + $0x28] sm:$0xff]  ;;  %v88_v15 = vpack.c.bf16 %v80_v13, %v80_v13  ;;  %v1453_v16 = vld [vmem:[%s1703_s3 + $0x38] sm:$0xff]  }
  0x3c   :  { %1240 = vmatpush3.bf16.msra.mxu1 %v1412_v23  ;;  %1219 = vmatprep.subr.bf16.mxu0 %v1413_v24  ;;  %v1452_v7 = vld [vmem:[#allocation2 + $0x180] sm:$0xff]   ;;  %v87_v10 = vpack.c.bf16 %v79_v8, %v79_v8  ;;  %v1454_v18 = vld [vmem:[%s1703_s3 + $0x30] sm:$0xff]   ;;  %v1455_v19 = vld [vmem:[%s1703_s3 + $0x28] sm:$0xff]  }
  0x3d   :  { %1241 = vmatprep.subr.bf16.mxu1 %v1414_v25  ;;  %v78_v12 = vld [vmem:[%s1700_s0 + $0x20] sm:$0xff]  ;;  %v1457_v21 = vld [vmem:[%s1703_s3 + $0x18] sm:$0xff]   ;;  %v1458_v22 = vld [vmem:[%s1703_s3 + $0x10] sm:$0xff]  }
  0x3e   :  { %v86_v14 = vpack.c.bf16 %v78_v12, %v78_v12  ;;  %v1456_v20 = vld [vmem:[%s1703_s3 + $0x20] sm:$0xff]   ;;  %v1459_v23 = vld [vmem:[%s1703_s3 + $0x8] sm:$0xff]   ;;  %v1461_v25 = vld [vmem:[#allocation4 + $0x38] sm:$0xff]  }
  0x3f   :  { %1220 = vmatpush3.bf16.msra.mxu0 %v1415_v26  ;;  %v1460_v24 = vld [vmem:[%s1703_s3] sm:$0xff]   ;;  %v1462_v26 = vld [vmem:[#allocation4 + $0x30] sm:$0xff]  }
  0x40   :  { %1242 = vmatpush3.bf16.msra.mxu1 %v1416_v27  ;;  %1221 = vmatprep.subr.bf16.mxu0 %v1417_v28  ;;  %v1463_v27 = vld [vmem:[#allocation4 + $0x28] sm:$0xff]   ;;  %v1464_v28 = vld [vmem:[#allocation4 + $0x20] sm:$0xff]  }
  0x41   :  { %1243 = vmatprep.subr.bf16.mxu1 %v1418_v29  ;;  %v1465_v29 = vld [vmem:[#allocation4 + $0x18] sm:$0xff]   ;;  %v1189_v12 = vld [vmem:[%s1706_s6] ss:$0 sm:$0xff] }
  0x43   :  { %1222 = vmatpush3.bf16.msra.mxu0 %v1419_v30  ;;  %v1466_v30 = vld [vmem:[#allocation4 + $0x10] sm:$0xff]  }
  0x44   :  { %1244 = vmatpush3.bf16.msra.mxu1 %v1420_v31  ;;  %1251 = vmatprep.subr.bf16.mxu0 %v1421_v40  ;;  %v1115_v40 = vld [vmem:[%s1702_s2] ss:$0 sm:$0xff] }
  0x45   :  { %1273 = vmatprep.subr.bf16.mxu1 %v1422_v41 }
  0x46   :  { %642 = vmatmul.mubr.bf16.vlgmr.msra.gmra.mxu0 %v82_v37 }
  0x47   :  { %682 = vmatmul.mubr.bf16.vlgmr.msra.gmra.mxu1 %v84_v39  ;;  %1252 = vmatpush3.bf16.msra.mxu0 %v1423_v42 }
  0x48   :  { %1274 = vmatpush3.bf16.msra.mxu1 %v1424_v43  ;;  %1253 = vmatprep.subr.bf16.mxu0 %v1425_v44 }
  0x49   :  { %1275 = vmatprep.subr.bf16.mxu1 %v1426_v45  ;;  %721 = vmatprep.mubr.bf16.mxu0 %v87_v10  ;;  %v1475_v10 = vld [vmem:[#allocation6 + $0x8] sm:$0xff]  }
  0x4a   :  { %761 = vmatprep.mubr.bf16.mxu1 %v89_v11  ;;  %v1476_v11 = vld [vmem:[#allocation6] sm:$0xff]  }
  0x4b   :  { %1254 = vmatpush3.bf16.msra.mxu0 %v1427_v46 }
  0x4c   :  { %1276 = vmatpush3.bf16.msra.mxu1 %v1428_v47  ;;  %1255 = vmatprep.subr.bf16.mxu0 %v1429_v48 }
  0x4d   :  { %1277 = vmatprep.subr.bf16.mxu1 %v1430_v49 }
  0x4f   :  { %1256 = vmatpush3.bf16.msra.mxu0 %v1431_v50 }
  0x50   :  { %1278 = vmatpush3.bf16.msra.mxu1 %v1432_v51  ;;  %1257 = vmatprep.subr.bf16.mxu0 %v1433_v52 }
  0x51   :  { %1279 = vmatprep.subr.bf16.mxu1 %v1434_v53 }
  0x53   :  { %1258 = vmatpush3.bf16.msra.mxu0 %v1435_v54 }
  0x54   :  { %1280 = vmatpush3.bf16.msra.mxu1 %v1436_v55  ;;  %1259 = vmatprep.subr.bf16.mxu0 %v1437_v56 }
  0x55   :  { %1281 = vmatprep.subr.bf16.mxu1 %v1438_v57 }
  0x57   :  { %1260 = vmatpush3.bf16.msra.mxu0 %v1439_v58  ;;  %v1467_v58 = vld [vmem:[#allocation4 + $0x8] sm:$0xff]  }
  0x58   :  { %1282 = vmatpush3.bf16.msra.mxu1 %v1440_v59  ;;  %1261 = vmatprep.subr.bf16.mxu0 %v1441_v60  ;;  %v1468_v59 = vld [vmem:[#allocation4] sm:$0xff]   ;;  %v1469_v60 = vld [vmem:[#allocation6 + $0x38] sm:$0xff]  }
  0x59   :  { %1283 = vmatprep.subr.bf16.mxu1 %v1442_v61  ;;  %v1470_v61 = vld [vmem:[#allocation6 + $0x30] sm:$0xff]  }
  0x5b   :  { %1262 = vmatpush3.bf16.msra.mxu0 %v1443_v62  ;;  %v1471_v62 = vld [vmem:[#allocation6 + $0x28] sm:$0xff]  }
  0x5c   :  { %1284 = vmatpush3.bf16.msra.mxu1 %v1444_v63  ;;  %1263 = vmatprep.subr.bf16.mxu0 %v1445_v0  ;;  %v1472_v63 = vld [vmem:[#allocation6 + $0x20] sm:$0xff]   ;;  %v1473_v0 = vld [vmem:[#allocation6 + $0x18] sm:$0xff]  }
  0x5d   :  { %1285 = vmatprep.subr.bf16.mxu1 %v1446_v1  ;;  %v1474_v1 = vld [vmem:[#allocation6 + $0x10] sm:$0xff]  }
  0x5f   :  { %1264 = vmatpush3.bf16.msra.mxu0 %v1447_v2  ;;  %v1180_v2 = vld [vmem:[%s1704_s4] ss:$0 sm:$0xff] }
  0x60   :  { %1286 = vmatpush3.bf16.msra.mxu1 %v1448_v3  ;;  %1265 = vmatprep.subr.bf16.mxu0 %v1449_v4 }
  0x61   :  { %1287 = vmatprep.subr.bf16.mxu1 %v1450_v5 }
  0x63   :  { %1266 = vmatpush3.bf16.msra.mxu0 %v1451_v6 }
  0x64   :  { %1288 = vmatpush3.bf16.msra.mxu1 %v1452_v7  ;;  %1322 = vmatprep.subr.bf16.mxu0 %v1546_v17 }
  0x65   :  { %1342 = vmatprep.subr.bf16.mxu1 %v1546_v17 }
  0x66   :  { %722 = vmatmul.mubr.bf16.vlgmr.msra.gmra.mxu0 %v86_v14 }
  0x67   :  { %762 = vmatmul.mubr.bf16.vlgmr.msra.gmra.mxu1 %v88_v15  ;;  %1323 = vmatpush3.bf16.msra.mxu0 %v1453_v16 }
  0x68   :  { %1324 = vmatprep.subr.bf16.mxu0 %v1546_v17  ;;  %1338 = vmatprep.mubr.msk.bf16.mxu0 %vm1547_vm0, %v1546_v17 }
  0x69   :  { %1358 = vmatprep.mubr.msk.bf16.mxu1 %vm1547_vm0, %v1546_v17  ;;  %1343 = vmatpush3.bf16.msra.mxu1 %v1461_v25 }
  0x6a   :  { %1344 = vmatprep.subr.bf16.mxu1 %v1546_v17 }
  0x6b   :  { %1325 = vmatpush3.bf16.msra.mxu0 %v1454_v18 }
  0x6c   :  { %1326 = vmatprep.subr.bf16.mxu0 %v1546_v17 }
  0x6d   :  { %1345 = vmatpush3.bf16.msra.mxu1 %v1462_v26 }
  0x6e   :  { %1346 = vmatprep.subr.bf16.mxu1 %v1546_v17 }
  0x6f   :  { %1327 = vmatpush3.bf16.msra.mxu0 %v1455_v19 }
  0x70   :  { %1328 = vmatprep.subr.bf16.mxu0 %v1546_v17 }
  0x71   :  { %1347 = vmatpush3.bf16.msra.mxu1 %v1463_v27 }
  0x72   :  { %1348 = vmatprep.subr.bf16.mxu1 %v1546_v17 }
  0x73   :  { %1329 = vmatpush3.bf16.msra.mxu0 %v1456_v20 }
  0x74   :  { %1330 = vmatprep.subr.bf16.mxu0 %v1546_v17 }
  0x75   :  { %1349 = vmatpush3.bf16.msra.mxu1 %v1464_v28 }
  0x76   :  { %1350 = vmatprep.subr.bf16.mxu1 %v1546_v17 }
  0x77   :  { %1331 = vmatpush3.bf16.msra.mxu0 %v1457_v21  ;;  %v1198_v21 = vld [vmem:[%s1708_s8] ss:$0 sm:$0xff] }
  0x78   :  { %1332 = vmatprep.subr.bf16.mxu0 %v1546_v17 }
  0x79   :  { %1351 = vmatpush3.bf16.msra.mxu1 %v1465_v29 }
  0x7a   :  { %1352 = vmatprep.subr.bf16.mxu1 %v1546_v17 }
  0x7b   :  { %1333 = vmatpush3.bf16.msra.mxu0 %v1458_v22 }
  0x7c   :  { %1334 = vmatprep.subr.bf16.mxu0 %v1546_v17 }
  0x7d   :  { %1353 = vmatpush3.bf16.msra.mxu1 %v1466_v30 }
  0x7e   :  { %1354 = vmatprep.subr.bf16.mxu1 %v1546_v17 }
  0x7f   :  { %1335 = vmatpush3.bf16.msra.mxu0 %v1459_v23 }
  0x80   :  { %1336 = vmatprep.subr.bf16.mxu0 %v1546_v17 }
  0x81   :  { %1355 = vmatpush3.bf16.msra.mxu1 %v1467_v58 }
  0x82   :  { %1356 = vmatprep.subr.bf16.mxu1 %v1546_v17 }
  0x83   :  { %1337 = vmatpush3.bf16.msra.mxu0 %v1460_v24 }
  0x84   :  { %1362 = vmatprep.subr.bf16.mxu0 %v1546_v17 }
  0x85   :  { %1357 = vmatpush3.bf16.msra.mxu1 %v1468_v59 }
 0x106   :  { %v1223_v31 = vpop.f32.mrf.mxu0 }
 0x107   :  { %v1245_v32 = vpop.f32.mrf.mxu1 }
 0x108   :  { %v1224_v33 = vpop.f32.mrf.mxu0 }
 0x109   :  { %v1246_v34 = vpop.f32.mrf.mxu1  ;;  %v1225_v39 = vadd.f32 %v1224_v33, %v1223_v31 }
 0x10a   :  { %v1226_v35 = vpop.f32.mrf.mxu0  ;;  %v1247_v42 = vadd.f32 %v1246_v34, %v1245_v32 }
 0x10b   :  { %v1248_v36 = vpop.f32.mrf.mxu1  ;;  %v644_v41 = vadd.f32 %v1225_v39, %v1115_v40 }
 0x10c   :  { %v1227_v37 = vpop.f32.mrf.mxu0 }
 0x10d   :  { %v1249_v38 = vpop.f32.mrf.mxu1  ;;  %v684_v46 = vadd.f32 %v1247_v42, %v644_v41 }
 0x126   :  { %v1267_v43 = vpop.f32.mrf.mxu0 }
 0x127   :  { %v1289_v44 = vpop.f32.mrf.mxu1 }
 0x128   :  { %v1268_v45 = vpop.f32.mrf.mxu0 }
 0x129   :  { %v1269_v47 = vadd.f32 %v1268_v45, %v1267_v43  ;;  %v1290_v48 = vpop.f32.mrf.mxu1 }
 0x12a   :  { %v1270_v49 = vpop.f32.mrf.mxu0  ;;  %v1291_v51 = vadd.f32 %v1290_v48, %v1289_v44 }
 0x12b   :  { %v724_v50 = vadd.f32 %v1269_v47, %v684_v46  ;;  %v1292_v52 = vpop.f32.mrf.mxu1 }
 0x12c   :  { %v1271_v53 = vpop.f32.mrf.mxu0 }
 0x12d   :  { %v764_v54 = vadd.f32 %v1291_v51, %v724_v50  ;;  %v1293_v55 = vpop.f32.mrf.mxu1 }
 0x12f   :  { %v769_v56 = vmax.f32 %v764_v54, 0.0 }
 0x131   :  { %v770_v57 = vpack.c.bf16 %v769_v56, %v769_v56 }
 0x133   :  { %1339 = vmatmul.mubr.bf16.vlgmr.msra.gmra.mxu0 %v770_v57 }
 0x134   :  { %1378 = vmatprep.mubr.msk.bf16.mxu0 %vm1547_vm0, %v1546_v17  ;;  %1363 = vmatpush3.bf16.msra.mxu0 %v1469_v60 }
 0x135   :  { %1364 = vmatprep.subr.bf16.mxu0 %v1546_v17 }
 0x138   :  { %1365 = vmatpush3.bf16.msra.mxu0 %v1470_v61 }
 0x139   :  { %1366 = vmatprep.subr.bf16.mxu0 %v1546_v17 }
 0x13c   :  { %1367 = vmatpush3.bf16.msra.mxu0 %v1471_v62 }
 0x13d   :  { %1368 = vmatprep.subr.bf16.mxu0 %v1546_v17 }
 0x140   :  { %1369 = vmatpush3.bf16.msra.mxu0 %v1472_v63 }
 0x141   :  { %1370 = vmatprep.subr.bf16.mxu0 %v1546_v17 }
 0x144   :  { %1371 = vmatpush3.bf16.msra.mxu0 %v1473_v0 }
 0x145   :  { %1372 = vmatprep.subr.bf16.mxu0 %v1546_v17 }
 0x148   :  { %1373 = vmatpush3.bf16.msra.mxu0 %v1474_v1 }
 0x149   :  { %1374 = vmatprep.subr.bf16.mxu0 %v1546_v17 }
 0x14c   :  { %1375 = vmatpush3.bf16.msra.mxu0 %v1475_v10 }
 0x14d   :  { %1376 = vmatprep.subr.bf16.mxu0 %v1546_v17 }
 0x150   :  { %1377 = vmatpush3.bf16.msra.mxu0 %v1476_v11 }
 0x1f3   :  { %v876_v3 = vpop.f32.mrf.mxu0 }
 0x1f4   :  { %v877_v4 = vadd.f32 %v1180_v2, %v876_v3 }
 0x1f5   :  { %v1340_v5 = vpop.f32.mrf.mxu0 }
 0x1f6   :  { %v882_v6 = vmax.f32 %v877_v4, 0.0 }
 0x1f7   :  { %v879_v7 = vpop.f32.mrf.mxu0 }
 0x1f8   :  { %v883_v8 = vpack.c.bf16 %v882_v6, %v882_v6 }
 0x1f9   :  { %v1341_v9 = vpop.f32.mrf.mxu0 }
 0x1fa   :  { %1359 = vmatmul.mubr.bf16.vlgmr.msra.gmra.mxu1 %v883_v8 }
 0x2ba   :  { %v989_v13 = vpop.f32.mrf.mxu1 }
 0x2bb   :  { %v990_v14 = vadd.f32 %v1189_v12, %v989_v13 }
 0x2bc   :  { %v1360_v15 = vpop.f32.mrf.mxu1 }
 0x2bd   :  { %v995_v16 = vmax.f32 %v990_v14, 0.0 }
 0x2be   :  { %v992_v18 = vpop.f32.mrf.mxu1 }
 0x2bf   :  { %v996_v19 = vpack.c.bf16 %v995_v16, %v995_v16 }
 0x2c0   :  { %v1361_v20 = vpop.f32.mrf.mxu1 }
 0x2c1   :  { %1379 = vmatmul.mubr.bf16.vlgmr.msra.gmra.mxu0 %v996_v19 }
 0x381   :  { %v1102_v22 = vpop.f32.mrf.mxu0 }
 0x382   :  { %v1103_v17 = vadd.f32 %v1198_v21, %v1102_v22 }
 0x383   :  { %v1380_v23 = vpop.f32.mrf.mxu0 }
 0x384   :  { %1108 = vst [vmem:[%s1709_s9] sm:$0xff] %v1103_v17 }
 0x385   :  { %v1105_v24 = vpop.f32.mrf.mxu0 }
 0x387   :  { %v1381_v25 = vpop.f32.mrf.mxu0 }
 0x388   :  { %1113 = vsyncpa [#allocation3], 1 }
 0x389   :  { %1114 = vsyncpa [#allocation5], 1 }

</bundles_post_ra>
